<compile_context>
chip_gen: v6e
topology: v6e:2x2x1
jax: 0.10.0
libtpu: 0.0.40
codegen_flags: <defaults>
</compile_context>

<pallas_src>
import math
from typing import NamedTuple

import jax
import jax.numpy as jnp
from jax.experimental import pallas as pl
from jax.experimental.pallas import tpu as pltpu


def _round_up(x, m):
    return (x + m - 1) // m * m


# --------------------------------------------------------------------------
# Kernels
# --------------------------------------------------------------------------
def _single_step_kernel(x_ref, w_ref, aux_ref, o_ref):
    """Whole K fits in one tile: no accumulator scratch, no k grid axis."""
    w = w_ref[...]
    acc = jax.lax.dot_general(
        x_ref[...], w,
        dimension_numbers=(((1,), (0,)), ((), ())),
        preferred_element_type=jnp.float32,
    )
    # Fused Lipschitz column scale: sum(|W^T|, axis=0) == sum(|W|, axis=1).
    row_abs = jnp.sum(jnp.abs(w).astype(jnp.float32), axis=0, keepdims=True)
    aux = aux_ref[...]                      # (2, tn): row 0 = bias, row 1 = lipc
    bias, lipc = aux[0:1, :], aux[1:2, :]
    scale = jnp.minimum(lipc / row_abs, 1.0)
    o_ref[...] = (acc * scale + bias).astype(o_ref.dtype)


def _multi_step_kernel(x_ref, w_ref, aux_ref, o_ref, acc_ref, abs_ref):
    """K split over the (innermost, 'arbitrary') grid axis."""
    k = pl.program_id(2)
    nk = pl.num_programs(2)

    w = w_ref[...]
    part = jax.lax.dot_general(
        x_ref[...], w,
        dimension_numbers=(((1,), (0,)), ((), ())),
        preferred_element_type=jnp.float32,
    )
    asum = jnp.sum(jnp.abs(w).astype(jnp.float32), axis=0, keepdims=True)

    @pl.when(k == 0)
    def _first():
        # Store directly: no zero-init + read-modify-write on the first step.
        acc_ref[...] = part
        abs_ref[...] = asum

    @pl.when((k > 0) & (k < nk - 1))
    def _middle():
        acc_ref[...] += part
        abs_ref[...] += asum

    @pl.when(k == nk - 1)
    def _last():
        # Fold the final dot into the epilogue; never re-store the accumulator.
        total = acc_ref[...] + part
        row_abs = abs_ref[...] + asum
        aux = aux_ref[...]
        bias, lipc = aux[0:1, :], aux[1:2, :]
        scale = jnp.minimum(lipc / row_abs, 1.0)
        o_ref[...] = (total * scale + bias).astype(o_ref.dtype)


# --------------------------------------------------------------------------
# Parameter preparation (run once per weight update, NOT per forward call)
# --------------------------------------------------------------------------
class PreparedParams(NamedTuple):
    w_t: jax.Array        # (Kp, Np) transposed, padded weight in compute dtype
    bias_row: jax.Array   # (1, Np) f32, padded
    out_features: int
    in_features: int
    tn: int
    tk: int


def prepare_params(weight, bias, *, tn=512, tk=1024, compute_dtype=None, min_n_tiles=2):
    """Hoist the per-call weight transpose / pad (and bias pad) out of the hot path."""
    N, K = weight.shape
    assert bias.shape == (N,)
    cdt = jnp.dtype(compute_dtype) if compute_dtype is not None else jnp.dtype(weight.dtype)

    tn = max(128, _round_up(tn, 128))
    tk = max(128, _round_up(tk, 128))
    tn = min(tn, _round_up(N, 128))
    tk = min(tk, _round_up(K, 128))
    # v7x megacore heuristic: batch often collapses to one i tile, so keep at
    # least `min_n_tiles` j tiles (when N allows) instead of maximizing tn.
    while tn > 128 and _round_up(N, tn) // tn < min_n_tiles:
        tn = max(128, (tn // 2) // 128 * 128)

    Np = _round_up(N, tn)
    Kp = _round_up(K, tk)

    w_t = jnp.pad(weight.T.astype(cdt), ((0, Kp - K), (0, Np - N)))          # (Kp, Np)
    bias_row = jnp.pad(bias.astype(jnp.float32), (0, Np - N)).reshape(1, Np)  # (1, Np)
    return PreparedParams(w_t, bias_row, N, K, tn, tk)


# --------------------------------------------------------------------------
# Forward
# --------------------------------------------------------------------------
def lipschitz_linear_forward(x, params: PreparedParams, c, *, tm=256):
    """x: (batch, in_features) -> (batch, out_features)."""
    M, K = x.shape
    assert K == params.in_features, "weight / input feature mismatch"
    N = params.out_features
    Kp, Np = params.w_t.shape
    tn, tk = params.tn, params.tk
    cdt = params.w_t.dtype
    out_dtype = x.dtype

    sub = {4: 8, 2: 16, 1: 32}.get(jnp.dtype(cdt).itemsize, 8)
    tm = _round_up(min(tm, _round_up(M, sub)), sub)
    Mp = _round_up(M, tm)

    x_p = jnp.pad(x.astype(cdt), ((0, Mp - M), (0, Kp - K)))

    # lipc = exp(c + log1p(exp(-c))) == 1 + exp(c); the latter is the stable form
    # (no overflow via exp(-c) for very negative c).
    c32 = jnp.asarray(c, jnp.float32).reshape(-1)[0]
    lipc = 1.0 + jnp.exp(c32)
    aux = jnp.concatenate(
        [params.bias_row, jnp.broadcast_to(lipc, (1, Np)).astype(jnp.float32)], axis=0
    )  # (2, Np): row 0 = bias, row 1 = lipc

    nm, nn, nk = Mp // tm, Np // tn, Kp // tk

    if nk == 1:
        kernel = _single_step_kernel
        grid = (nm, nn)
        in_specs = [
            pl.BlockSpec((tm, tk), lambda i, j: (i, 0)),   # X tile
            pl.BlockSpec((tk, tn), lambda i, j: (0, j)),   # W^T tile
            pl.BlockSpec((2, tn), lambda i, j: (0, j)),    # [bias; lipc] rows
        ]
        out_spec = pl.BlockSpec((tm, tn), lambda i, j: (i, j))
        scratch = ()
        dims = ("parallel", "parallel")
    else:
        kernel = _multi_step_kernel
        grid = (nm, nn, nk)
        in_specs = [
            pl.BlockSpec((tm, tk), lambda i, j, k: (i, k)),
            pl.BlockSpec((tk, tn), lambda i, j, k: (k, j)),
            pl.BlockSpec((2, tn), lambda i, j, k: (0, j)),
        ]
        out_spec = pl.BlockSpec((tm, tn), lambda i, j, k: (i, j))
        scratch = (
            pltpu.VMEM((tm, tn), jnp.float32),   # f32 accumulator
            pltpu.VMEM((1, tn), jnp.float32),    # fused |W| row-sum accumulator
        )
        dims = ("parallel", "parallel", "arbitrary")

    c_bytes = jnp.dtype(cdt).itemsize
    o_bytes = jnp.dtype(out_dtype).itemsize
    vmem_est = (
        2 * (tm * tk + tk * tn) * c_bytes   # double-buffered X / W tiles
        + 2 * 2 * tn * 4                    # double-buffered aux rows
        + 2 * tm * tn * o_bytes             # double-buffered output tile
        + tm * tn * 4 + tn * 4              # accumulator + abs-sum scratch
    )
    # Safe on every generation (v7x physical VMEM is 64 MiB per TensorCore).
    vmem_limit = int(min(max(2 * vmem_est, 32 * 1024 * 1024), 48 * 1024 * 1024))

    out_p = pl.pallas_call(
        kernel,
        out_shape=jax.ShapeDtypeStruct((Mp, Np), out_dtype),
        grid_spec=pltpu.PrefetchScalarGridSpec(
            num_scalar_prefetch=0,
            grid=grid,
            in_specs=in_specs,
            out_specs=out_spec,
            scratch_shapes=scratch,
        ),
        compiler_params=pltpu.CompilerParams(
            dimension_semantics=dims,
            vmem_limit_bytes=vmem_limit,
        ),
        cost_estimate=pl.CostEstimate(
            flops=2 * Mp * Np * Kp,
            transcendentals=0,
            bytes_accessed=(
                Mp * Kp * c_bytes      # X
                + Kp * Np * c_bytes    # W^T
                + 2 * Np * 4           # bias / lipc rows
                + Mp * Np * o_bytes    # output
            ),
        ),
    )(x_p, params.w_t, aux)

    return out_p[:M, :N]


def geometric_mean_lipschitz_linear(x, weight, bias, c, *, tm=256, tn=512, tk=1024,
                                    compute_dtype=None, min_n_tiles=2):
    """Convenience one-shot wrapper (prepare + forward). Prefer prepare_params()
    once at setup + lipschitz_linear_forward() per call for repeated use."""
    params = prepare_params(weight, bias, tn=tn, tk=tk,
                            compute_dtype=compute_dtype, min_n_tiles=min_n_tiles)
    return lipschitz_linear_forward(x, params, c, tm=tm)


# --------------------------------------------------------------------------
# Init / reference (mirror the PyTorch module)
# --------------------------------------------------------------------------
def init_params(key, in_features, out_features):
    """kaiming_uniform_(a=sqrt(5)) + uniform bias + initialize_c, like the module."""
    kw, kb = jax.random.split(key)
    bound = 1.0 / math.sqrt(in_features)
    weight = jax.random.uniform(
        kw, (out_features, in_features), jnp.float32, minval=-bound, maxval=bound)
    bias = jax.random.uniform(
        kb, (out_features,), jnp.float32, minval=-bound, maxval=bound)
    c = jnp.log(jnp.max(jnp.sum(jnp.abs(weight), axis=1)))
    return weight, bias, c


def reference_forward(x, weight, bias, c):
    lipc = jnp.exp(c + jnp.log1p(jnp.exp(-c)))
    scale = jnp.minimum(lipc / jnp.sum(jnp.abs(weight), axis=1), 1.0)
    return x @ (weight * scale[:, None]).T + bias[None, :]


# --------------------------------------------------------------------------
if __name__ == "__main__":
    key = jax.random.PRNGKey(0)

    # Case 1: small aligned shapes -> single-K-step kernel, single grid cell.
    k_x, k_p, key = jax.random.split(key, 3)
    batch, in_f, out_f = 8, 32, 32
    x = jax.random.normal(k_x, (batch, in_f), jnp.float32)
    weight, bias, c = init_params(k_p, in_f, out_f)
    params = prepare_params(weight, bias)                     # hoisted once
    out = jax.block_until_ready(lipschitz_linear_forward(x, params, c))
    ref = reference_forward(x, weight, bias, c)
    assert out.shape == (batch, out_f)
    assert jnp.allclose(out, ref, atol=1e-4, rtol=1e-4), "mismatch (case 1)"

    # Case 2a: non-aligned shapes, default tiles, and a c that makes scale < 1
    # for some rows (exercises the fused abs-sum / clamp path).
    k_x2, k_p2, key = jax.random.split(key, 3)
    b2, in2, out2 = 24, 300, 200
    x2 = jax.random.normal(k_x2, (b2, in2), jnp.float32)
    w2, bias2, c2 = init_params(k_p2, in2, out2)
    c2_small = c2 - 2.0
    p2 = prepare_params(w2, bias2)
    out_2a = jax.block_until_ready(lipschitz_linear_forward(x2, p2, c2_small))
    ref_2a = reference_forward(x2, w2, bias2, c2_small)
    assert out_2a.shape == (b2, out2)
    assert jnp.allclose(out_2a, ref_2a, atol=1e-4, rtol=1e-4), "mismatch (case 2a)"

    # Case 2b: forced small tiles -> multi-K accumulation path (first/mid/last k).
    p2b = prepare_params(w2, bias2, tn=128, tk=128)
    out_2b = jax.block_until_ready(lipschitz_linear_forward(x2, p2b, c2, tm=16))
    ref_2b = reference_forward(x2, w2, bias2, c2)
    assert jnp.allclose(out_2b, ref_2b, atol=1e-4, rtol=1e-4), "mismatch (case 2b)"

    # Case 3: bf16 MXU compute path (f32 accumulate + f32 epilogue), loose tolerance.
    p3 = prepare_params(w2, bias2, compute_dtype=jnp.bfloat16)
    out_3 = jax.block_until_ready(lipschitz_linear_forward(x2, p3, c2))
    assert out_3.dtype == x2.dtype
    assert jnp.allclose(out_3, ref_2b, atol=5e-2, rtol=5e-2), "mismatch (case 3, bf16)"

    # Convenience one-shot wrapper.
    out_c = jax.block_until_ready(geometric_mean_lipschitz_linear(x, weight, bias, c))
    assert jnp.allclose(out_c, ref, atol=1e-4, rtol=1e-4), "mismatch (convenience)"

    print("KERNEL_OK")
</pallas_src>

<mosaic_0001>
module attributes {stable_mosaic.version = 11 : i64} {
  func.func @_single_step_kernel(%arg0: i32, %arg1: i32, %arg2: memref<8x128xf32, #tpu.memory_space<vmem>>, %arg3: memref<128x128xf32, #tpu.memory_space<vmem>>, %arg4: memref<2x128xf32, #tpu.memory_space<vmem>>, %arg5: memref<8x128xf32, #tpu.memory_space<vmem>>) attributes {dimension_semantics = [#tpu.dimension_semantics<parallel>, #tpu.dimension_semantics<parallel>], iteration_bounds = array<i64: 1, 1>, scalar_prefetch = 0 : i64, scratch_operands = 0 : i64, tpu.core_type = #tpu.core_type<tc>, window_params = [{transform_indices = @transform_0, window_bounds = array<i64: 8, 128>}, {transform_indices = @transform_1, window_bounds = array<i64: 128, 128>}, {transform_indices = @transform_2, window_bounds = array<i64: 2, 128>}, {transform_indices = @transform_3, window_bounds = array<i64: 8, 128>}]} {
    %c0 = arith.constant 0 : index
    %c0_0 = arith.constant 0 : index
    %0 = vector.load %arg3[%c0, %c0_0] : memref<128x128xf32, #tpu.memory_space<vmem>>, vector<128x128xf32>
    %c0_1 = arith.constant 0 : index
    %c0_2 = arith.constant 0 : index
    %1 = vector.load %arg2[%c0_1, %c0_2] : memref<8x128xf32, #tpu.memory_space<vmem>>, vector<8x128xf32>
    %cst = arith.constant dense<0.000000e+00> : vector<8x128xf32>
    %2 = tpu.matmul %1, %0, %cst {dimension_numbers = #tpu.dot_dimension_numbers<[1], [0], [0], [1], [0, 0, 1, 1], [], []>} : vector<8x128xf32>, vector<128x128xf32>, vector<8x128xf32> -> vector<8x128xf32>
    %3 = math.absf %0 : vector<128x128xf32>
    %cst_3 = arith.constant dense<0.000000e+00> : vector<128xf32>
    %4 = vector.multi_reduction <add>, %3, %cst_3 [0] : vector<128x128xf32> to vector<128xf32>
    %5 = vector.shape_cast %4 : vector<128xf32> to vector<1x128xf32>
    %c0_4 = arith.constant 0 : index
    %c0_5 = arith.constant 0 : index
    %6 = vector.load %arg4[%c0_4, %c0_5] : memref<2x128xf32, #tpu.memory_space<vmem>>, vector<2x128xf32>
    %7 = vector.extract_strided_slice %6 {offsets = [0, 0], sizes = [1, 128], strides = [1, 1]} : vector<2x128xf32> to vector<1x128xf32>
    %8 = vector.extract_strided_slice %6 {offsets = [1, 0], sizes = [1, 128], strides = [1, 1]} : vector<2x128xf32> to vector<1x128xf32>
    %9 = arith.divf %8, %5 : vector<1x128xf32>
    %cst_6 = arith.constant 1.000000e+00 : f32
    %10 = vector.broadcast %cst_6 : f32 to vector<1x128xf32>
    %11 = arith.minimumf %9, %10 : vector<1x128xf32>
    %12 = vector.broadcast %11 : vector<1x128xf32> to vector<8x128xf32>
    %13 = arith.mulf %2, %12 : vector<8x128xf32>
    %14 = vector.broadcast %7 : vector<1x128xf32> to vector<8x128xf32>
    %15 = arith.addf %13, %14 : vector<8x128xf32>
    %c0_7 = arith.constant 0 : index
    %c0_8 = arith.constant 0 : index
    %16 = vector.load %arg5[%c0_7, %c0_8] : memref<8x128xf32, #tpu.memory_space<vmem>>, vector<8x128xf32>
    tpu.vector_store %arg5[%c0_7, %c0_8], %15 {strides = array<i32>} : memref<8x128xf32, #tpu.memory_space<vmem>>, vector<8x128xf32>,
    return
  }
  func.func @transform_0(%arg0: i32, %arg1: i32) -> (i32, i32) {
    %c0_i32 = arith.constant 0 : i32
    %c0_i32_0 = arith.constant 0 : i32
    return %arg0, %c0_i32 : i32, i32
  }
  func.func @transform_1(%arg0: i32, %arg1: i32) -> (i32, i32) {
    %c0_i32 = arith.constant 0 : i32
    %c0_i32_0 = arith.constant 0 : i32
    return %c0_i32, %arg1 : i32, i32
  }
  func.func @transform_2(%arg0: i32, %arg1: i32) -> (i32, i32) {
    %c0_i32 = arith.constant 0 : i32
    %c0_i32_0 = arith.constant 0 : i32
    return %c0_i32, %arg1 : i32, i32
  }
  func.func @transform_3(%arg0: i32, %arg1: i32) -> (i32, i32) {
    %c0_i32 = arith.constant 0 : i32
    return %arg0, %arg1 : i32, i32
  }
}

</mosaic_0001>

<bundles_post_ra>
// kernel: tpu_custom_call.1
= control target key start
LH: loop header
LB: loop body
LE: loop exit
PB: predicated region body
PF: predicated region fallthrough
CT: control target
= control target key end

     0   :  { %8 = vsyncpa [#allocation3], 0  ;;  %s399_s0 = inlined_call_operand.hbm [shape: f32[8,128], index: 0, kind: input, shape index: {}]   ;;  %s400_s1 = inlined_call_operand.hbm [shape: f32[128,128], index: 1, kind: input, shape index: {}]   ;;  %s401_s2 = inlined_call_operand.vmem [shape: f32[2,128], index: 2, kind: input, shape index: {}]   ;;  %s402_s3 = inlined_call_operand.hbm [shape: f32[8,128], index: 3, kind: output, shape index: {}]  }
   0x1   :  { %9 = vsyncpa [#allocation6], 0 }
   0x2   :  { %10 = vsyncpa [#allocation4], 0  ;;  %s323_s12 = smov [#allocation2]   ;;  %s324_s14 = smov [#allocation5]  }
   0x3   :  { %s17_s13 = sshll.u32 %s323_s12, 4  ;;  %s26_s15 = sshll.u32 %s324_s14, 4  ;;  %s18_s13 = int_to_ptr.vmem [resolvable:$true] %s17_s13  ;;  %s27_s15 = int_to_ptr.vmem [resolvable:$true] %s26_s15 }
   0x4   :  { %s265_s16 = scalar_lea.vmem %s18_s13, 128  ;;  %p270_p1 = scmp.lt.s32.totalorder %s18_s13, %s18_s13 }
   0x5   :  { %p266_p0 = scmp.ne.s32.totalorder %s18_s13, %s265_s16  ;;  %p271_p2 = scmp.lt.s32.totalorder %s265_s16, %s265_s16 }
   0x7   :  { %p272_p3 = por %p271_p2, %p270_p1 }
   0x9   :  { %p273_p4 = pnand %p272_p3, %p266_p0 }
   0xb   :  { %276 = shalt.err (!%p273_p4)
}
   0xc   :  { %20 = dma.hbm_to_vmem [thread:$0]  %s399_s0, 128, %s18_s13, [#allocation3]  }
   0xd   :  { %s285_s19 = scalar_lea.vmem %s27_s15, 2048  ;;  %p290_p6 = scmp.lt.s32.totalorder %s27_s15, %s27_s15 }
   0xe   :  { %p286_p5 = scmp.ne.s32.totalorder %s27_s15, %s285_s19  ;;  %p291_p7 = scmp.lt.s32.totalorder %s285_s19, %s285_s19 }
  0x10   :  { %p292_p8 = por %p291_p7, %p290_p6 }
  0x12   :  { %p293_p9 = pnand %p292_p8, %p286_p5 }
  0x14   :  { %296 = shalt.err (!%p293_p9)
}
  0x15   :  { %s325_s20 = smov 128   ;;  %s326_s21 = smov 8  }
  0x16   :  { %32 = dma.hbm_to_vmem [thread:$0]  %s400_s1, 2048, %s27_s15, [#allocation6], %s325_s20, %s325_s20, %s326_s21  }
  0x17   :  { %317 = dma.done.wait [#allocation3], 128  }
  0x18   :  { %318 = vsyncadd [#allocation3], 4294967168 }
  0x19   :  { %319 = dma.done.wait [#allocation6], 2048  }
  0x1a   :  { %320 = vsyncadd [#allocation6], 4294965248  ;;  %v327_v0 = vmov 0.0   ;;  %vm328_vm0 = vmmov 0   ;;  %v358_v1 = vld [vmem:[#allocation5 + $0x78] sm:$0xff]  ;;  %v360_v2 = vld [vmem:[#allocation5 + $0x70] sm:$0xff]  ;;  %v169_v55 = vlaneseq }
  0x1b   :  { %213 = vmatprep.subr.mxu0 %v327_v0  ;;  %245 = vmatprep.mubr.msk.f32.mxu0 %vm328_vm0, %v327_v0  ;;  %v364_v3 = vld [vmem:[#allocation5 + $0x68] sm:$0xff]  ;;  %v368_v4 = vld [vmem:[#allocation5 + $0x60] sm:$0xff]  ;;  %v372_v5 = vld [vmem:[#allocation5 + $0x58] sm:$0xff]  ;;  %v142_v45 = vand.u32 2147483647, %v360_v2  ;;  %s329_s24 = smov [#allocation7]  }
  0x1c   :  { %214 = vmatpush3.msra.mxu0 %v358_v1  ;;  %v51_v6 = vld [vmem:[#allocation5 + $0x50] sm:$0xff]  ;;  %v42_v7 = vld [vmem:[#allocation5 + $0x8] sm:$0xff]  ;;  %v41_v11 = vld [vmem:[#allocation5] sm:$0xff]  ;;  %v139_v36 = vand.u32 2147483647, %v372_v5  ;;  %v170_v59 = vshrl.u32 %v169_v55, 7 }
  0x1d   :  { %215 = vmatprep.subr.mxu0 %v327_v0  ;;  %v129_v8 = vand.u32 2147483647, %v42_v7  ;;  %v50_v9 = vld [vmem:[#allocation5 + $0x48] sm:$0xff]  ;;  %v43_v10 = vld [vmem:[#allocation5 + $0x10] sm:$0xff]  ;;  %v128_v13 = vand.u32 2147483647, %v41_v11 }
  0x1e   :  { %216 = vmatpush3.msra.mxu0 %v360_v2  ;;  %v130_v12 = vand.u32 2147483647, %v43_v10  ;;  %v49_v14 = vld [vmem:[#allocation5 + $0x40] sm:$0xff]  ;;  %v44_v15 = vld [vmem:[#allocation5 + $0x18] sm:$0xff]  ;;  %v47_v22 = vld [vmem:[#allocation5 + $0x30] sm:$0xff]  ;;  %v171_v61 = vsub.s32 1, %v170_v59 }
  0x1f   :  { %217 = vmatprep.subr.mxu0 %v327_v0  ;;  %v131_v16 = vand.u32 2147483647, %v44_v15  ;;  %v144_v17 = vadd.f32 %v129_v8, %v128_v13  ;;  %v48_v18 = vld [vmem:[#allocation5 + $0x38] sm:$0xff]  ;;  %v45_v19 = vld [vmem:[#allocation5 + $0x20] sm:$0xff]  ;;  %v46_v23 = vld [vmem:[#allocation5 + $0x28] sm:$0xff]  ;;  %v176_v62 = vsub.s32 0, %v170_v59 }
  0x20   :  { %218 = vmatpush3.msra.mxu0 %v364_v3  ;;  %v132_v20 = vand.u32 2147483647, %v45_v19  ;;  %v133_v24 = vand.u32 2147483647, %v46_v23  ;;  %v134_v26 = vand.u32 2147483647, %v47_v22 }
  0x21   :  { %219 = vmatprep.subr.mxu0 %v327_v0  ;;  %v145_v21 = vadd.f32 %v144_v17, %v130_v12  ;;  %v135_v28 = vand.u32 2147483647, %v48_v18  ;;  %v136_v30 = vand.u32 2147483647, %v49_v14  ;;  %v137_v32 = vand.u32 2147483647, %v50_v9 }
  0x22   :  { %220 = vmatpush3.msra.mxu0 %v368_v4  ;;  %v138_v34 = vand.u32 2147483647, %v51_v6  ;;  %v57_v38 = vld [vmem:[#allocation2] sm:$0xff]  ;;  %v140_v39 = vand.u32 2147483647, %v368_v4  ;;  %s186_s25 = sshll.u32 %s329_s24, 4  ;;  %s187_s25 = int_to_ptr.vmem [resolvable:$true] %s186_s25 }
  0x23   :  { %221 = vmatprep.subr.mxu0 %v327_v0  ;;  %v146_v25 = vadd.f32 %v145_v21, %v131_v16  ;;  %v141_v41 = vand.u32 2147483647, %v364_v3  ;;  %v143_v46 = vand.u32 2147483647, %v358_v1  ;;  %v165_v57 = vld [vmem:[%s401_s2] sm:$0x3]  ;;  %p302_p11 = scmp.lt.s32.totalorder %s187_s25, %s187_s25 }
  0x24   :  { %222 = vmatpush3.msra.mxu0 %v372_v5  ;;  %s297_s26 = scalar_lea.vmem %s187_s25, 128 }
  0x25   :  { %223 = vmatprep.subr.mxu0 %v327_v0  ;;  %v147_v27 = vadd.f32 %v146_v25, %v132_v20  ;;  %p298_p10 = scmp.ne.s32.totalorder %s187_s25, %s297_s26  ;;  %p303_p12 = scmp.lt.s32.totalorder %s297_s26, %s297_s26 }
  0x26   :  { %224 = vmatpush3.msra.mxu0 %v51_v6 }
  0x27   :  { %225 = vmatprep.subr.mxu0 %v327_v0  ;;  %v148_v29 = vadd.f32 %v147_v27, %v133_v24  ;;  %p304_p13 = por %p303_p12, %p302_p11 }
  0x28   :  { %226 = vmatpush3.msra.mxu0 %v50_v9 }
  0x29   :  { %227 = vmatprep.subr.mxu0 %v327_v0  ;;  %v149_v31 = vadd.f32 %v148_v29, %v134_v26  ;;  %p305_p0 = pnand %p304_p13, %p298_p10 }
  0x2a   :  { %228 = vmatpush3.msra.mxu0 %v49_v14 }
  0x2b   :  { %229 = vmatprep.subr.mxu0 %v327_v0  ;;  %v150_v33 = vadd.f32 %v149_v31, %v135_v28 }
  0x2c   :  { %230 = vmatpush3.msra.mxu0 %v48_v18 }
  0x2d   :  { %231 = vmatprep.subr.mxu0 %v327_v0  ;;  %v151_v35 = vadd.f32 %v150_v33, %v136_v30 }
  0x2e   :  { %232 = vmatpush3.msra.mxu0 %v47_v22 }
  0x2f   :  { %233 = vmatprep.subr.mxu0 %v327_v0  ;;  %v152_v37 = vadd.f32 %v151_v35, %v137_v32 }
  0x30   :  { %234 = vmatpush3.msra.mxu0 %v46_v23 }
  0x31   :  { %235 = vmatprep.subr.mxu0 %v327_v0  ;;  %v153_v40 = vadd.f32 %v152_v37, %v138_v34 }
  0x32   :  { %236 = vmatpush3.msra.mxu0 %v45_v19 }
  0x33   :  { %237 = vmatprep.subr.mxu0 %v327_v0  ;;  %v154_v42 = vadd.f32 %v153_v40, %v139_v36 }
  0x34   :  { %238 = vmatpush3.msra.mxu0 %v44_v15 }
  0x35   :  { %239 = vmatprep.subr.mxu0 %v327_v0  ;;  %v155_v43 = vadd.f32 %v154_v42, %v140_v39 }
  0x36   :  { %240 = vmatpush3.msra.mxu0 %v43_v10 }
  0x37   :  { %241 = vmatprep.subr.mxu0 %v327_v0  ;;  %v156_v44 = vadd.f32 %v155_v43, %v141_v41 }
  0x38   :  { %242 = vmatpush3.msra.mxu0 %v42_v7 }
  0x39   :  { %243 = vmatprep.subr.mxu0 %v327_v0  ;;  %v157_v47 = vadd.f32 %v156_v44, %v142_v45  ;;  %v177_v0 = vrot.slane %v165_v57, %v176_v62 }
  0x3a   :  { %244 = vmatpush3.msra.mxu0 %v41_v11 }
  0x3b   :  { %246 = vmatmul.mubr.f32.vlgmr.msra.gmra.mxu0 %v57_v38  ;;  %v158_v48 = vadd.f32 %v157_v47, %v143_v46 }
  0x3d   :  { %v159_v49 = vrot.slane %v158_v48, 4 }
  0x3f   :  { %v160_v50 = vadd.f32 %v159_v49, %v158_v48 }
  0x41   :  { %v161_v51 = vrot.slane %v160_v50, 2 }
  0x43   :  { %v162_v52 = vadd.f32 %v161_v51, %v160_v50 }
  0x45   :  { %v163_v53 = vrot.slane %v162_v52, 1 }
  0x47   :  { %v164_v54 = vadd.f32 %v163_v53, %v162_v52 }
  0x49   :  { %255 = vrcp.f32 %v164_v54 }
  0x56   :  { %v256_v56 = vpop.eup %255 }
  0x57   :  { %v167_v58 = vmul.f32 %v256_v56, %v165_v57 }
  0x59   :  { %v168_v60 = vmin.f32 %v167_v58, 1.0 }
  0x5b   :  { %v172_v63 = vrot.slane %v168_v60, %v171_v61 }
  0xfb   :  { %v124_v1 = vpop.f32.mrf.mxu0 }
  0xfc   :  { %v173_v2 = vmul.f32 %v172_v63, %v124_v1 }
  0xfd   :  { %v247_v3 = vpop.f32.mrf.mxu0 }
  0xfe   :  { %v178_v4 = vadd.f32 %v177_v0, %v173_v2 }
 0x100   :  { %179 = vst [vmem:[#allocation7] sm:$0xff] %v178_v4 }
 0x101   :  { %308 = shalt.err (!%p305_p0)
}
 0x102   :  { %189 = dma.vmem_to_hbm [thread:$0]  %s187_s25, 128, %s402_s3, [#allocation4]  }
 0x103   :  { %321 = dma.done.wait [#allocation4], 128  }
 0x104   :  { %322 = vsyncadd [#allocation4], 4294967168 }
 0x105   :  { %193 = vsyncpa [#allocation3], 1 }
 0x106   :  { %194 = vsyncpa [#allocation6], 1 }
 0x107   :  { %195 = vsyncpa [#allocation4], 1 }

</bundles_post_ra>
